<compile_context>
chip_gen: v7x
topology: tpu7x:2x2x1
jax: 0.10.0
libtpu: 0.0.40
codegen_flags: <defaults>
</compile_context>

<pallas_src>
import jax
import jax.numpy as jnp
from jax import lax
from jax.experimental import pallas as pl
from jax.experimental.pallas import tpu as pltpu

# small, module-consistent sizes
B = 2            # batch
S = 8            # sequence length
H = 32           # hidden size
F = 4 * H        # FFN intermediate (=128)
BS = B * S       # flattened batch*seq (=16)
LANE = 128
VOCAB = 64       # synthetic vocab
OUT_ROWS = 8     # lane/sublane-friendly output block
LOG2_S = S.bit_length() - 1
assert S == (1 << LOG2_S), "S must be a power of two for the shift-based batch ids"


def _layernorm(x, g, b, eps=1e-12):
    # One-pass formulation: the two cross-lane reductions are independent and
    # can be issued back-to-back on the XLU.
    m1 = jnp.mean(x, axis=-1, keepdims=True)
    m2 = jnp.mean(x * x, axis=-1, keepdims=True)
    var = m2 - m1 * m1
    return (x - m1) * lax.rsqrt(var + eps) * g + b


def encoder_kernel(ids_ref, mask_ref, tok_ref, pos_ref, w_ref, w2_ref, vec_ref, out_ref):
    ids = ids_ref[...]      # (BS, 1)   int32 token ids (flattened)
    mask = mask_ref[...]    # (1, BS)   int32 key mask (1=keep, 0=pad)
    tok = tok_ref[...]      # (VOCAB, H) token embedding table
    pos = pos_ref[...]      # (BS, H)   position embeddings (pre-tiled)
    w = w_ref[...]          # (H, 384)  [Wq|Wk|Wv@Wo|0  ,  W1  ,  Wp(pad)]
    w2 = w2_ref[...]        # (F, H)    FFN down-projection, natural orientation
    vec = vec_ref[...]      # (16, 128) biases / LN params

    # ---- embedding lookup: one-hot + MXU dot (MXU is otherwise idle; ~free) ----
    vocab_iota = lax.broadcasted_iota(jnp.int32, (BS, VOCAB), 1)
    one_hot = jnp.where(ids == vocab_iota, 1.0, 0.0)                      # (BS, VOCAB)
    x = jnp.dot(one_hot, tok, preferred_element_type=jnp.float32) + pos   # (BS, H)

    # ---- unpack vec slab: every H-wide param lane-0 aligned, one per row ----
    ln0_g, ln0_b = vec[0:1, 0:H], vec[1:2, 0:H]
    ln1_g, ln1_b = vec[2:3, 0:H], vec[3:4, 0:H]
    ln2_g, ln2_b = vec[4:5, 0:H], vec[5:6, 0:H]
    b2 = vec[6:7, 0:H]
    bp_pad = vec[7:8, :]        # (1, 128) pooler bias, zero past lane H
    b_qkv = vec[8:9, :]         # (1, 128) [bq | bk | bv@Wo + bo | 0]
    b1 = vec[9:10, :]           # (1, 128) FFN intermediate bias

    # ---- unpack weight slab: all slices are 128-lane tile-aligned ----
    w_qkv = w[:, 0:LANE]
    w1 = w[:, LANE:2 * LANE]
    wp_pad = w[:, 2 * LANE:3 * LANE]

    # embedding LayerNorm
    x = _layernorm(x, ln0_g, ln0_b)

    # fused Q/K/V' projection: one MXU push (Wo already folded into V' block)
    qkv = jnp.dot(x, w_qkv, preferred_element_type=jnp.float32) + b_qkv   # (BS, 128)
    q = qkv[:, 0:H]
    k = qkv[:, H:2 * H]
    v = qkv[:, 2 * H:3 * H]

    # block-diagonal batch mask + key padding, built in-kernel (VPU filler)
    row_b = jnp.right_shift(lax.broadcasted_iota(jnp.int32, (BS, BS), 0), LOG2_S)
    col_b = jnp.right_shift(lax.broadcasted_iota(jnp.int32, (BS, BS), 1), LOG2_S)
    keep = (row_b == col_b) & (mask > 0)                                   # (BS, BS)

    scale = 1.0 / (float(H) ** 0.5)
    scores = lax.dot_general(q, k, (((1,), (1,)), ((), ())),
                             preferred_element_type=jnp.float32) * scale   # (BS, BS)
    scores = jnp.where(keep, scores, -1e9)
    scores = scores - jnp.max(scores, axis=-1, keepdims=True)
    p = jnp.exp(scores)
    inv = pl.reciprocal(jnp.sum(p, axis=-1, keepdims=True), approx=True)   # EUP slot
    p = p * inv

    # Wo folded: attention output projection is just p @ v' (bias in b_qkv)
    attn_out = jnp.dot(p, v, preferred_element_type=jnp.float32)           # (BS, H)
    x = _layernorm(x + attn_out, ln1_g, ln1_b)

    # feed-forward (W2 in natural (K, N) orientation -> no transposed operand)
    h = jnp.dot(x, w1, preferred_element_type=jnp.float32) + b1
    h = jax.nn.gelu(h, approximate=True)   # tanh-approx GELU (EUP-friendly)
    ffn = jnp.dot(h, w2, preferred_element_type=jnp.float32) + b2
    x = _layernorm(x + ffn, ln2_g, ln2_b)

    # BERT pooler (single MXU push for all rows), in-kernel CLS row selection,
    # lane-dense stores; wrapper does a contiguous [:B, :H] slice.
    pooled = jnp.tanh(jnp.dot(x, wp_pad, preferred_element_type=jnp.float32) + bp_pad)
    out_ref[...] = jnp.zeros((OUT_ROWS, LANE), jnp.float32)
    for b in range(B):                       # B=2, statically unrolled
        out_ref[b:b + 1, :] = pooled[b * S:b * S + 1, :]


def dpr_wrapper_forward(input_ids, attention_mask, dummy_tensor, params):
    """Equivalent of Wrapper.forward: returns encoder(...).pooler_output, shape [B, H]."""
    del dummy_tensor  # unused by the PyTorch module as well

    ids = input_ids.reshape(BS, 1).astype(jnp.int32)        # flattened token ids
    mask = attention_mask.reshape(1, BS).astype(jnp.int32)  # flattened key mask

    fn = pl.pallas_call(
        encoder_kernel,
        out_shape=jax.ShapeDtypeStruct((OUT_ROWS, LANE), jnp.float32),
        in_specs=[pl.BlockSpec(memory_space=pltpu.MemorySpace.VMEM)] * 7,
        out_specs=pl.BlockSpec(memory_space=pltpu.MemorySpace.VMEM),
    )
    # TODO(synk): on v7x a gridless call uses one of the two TensorCores; add a
    # "parallel" batch grid axis if B grows beyond this toy shape.
    pooled = fn(ids, mask, params["tok_emb"], params["pos_full"],
                params["w_all"], params["w2"], params["vec"])
    return pooled[:B, :H]                                    # contiguous CLS slice


def init_params(key):
    ks = jax.random.split(key, 9)
    s = 0.02
    zeros_h = jnp.zeros((1, H), jnp.float32)

    tok_emb = s * jax.random.normal(ks[0], (VOCAB, H), jnp.float32)
    pos_emb = s * jax.random.normal(ks[1], (S, H), jnp.float32)
    wq = s * jax.random.normal(ks[2], (H, H), jnp.float32)
    wk = s * jax.random.normal(ks[3], (H, H), jnp.float32)
    wv = s * jax.random.normal(ks[4], (H, H), jnp.float32)
    wo = s * jax.random.normal(ks[5], (H, H), jnp.float32)
    w1 = s * jax.random.normal(ks[6], (H, F), jnp.float32)
    w2 = s * jax.random.normal(ks[7], (F, H), jnp.float32)
    wp = s * jax.random.normal(ks[8], (H, H), jnp.float32)

    ln_g = jnp.ones((1, H), jnp.float32)
    bq = bk = bv = bo = b2 = bp = zeros_h
    b1 = jnp.zeros((1, F), jnp.float32)

    # Fold Wo into the V block (exact: softmax rows sum to 1).
    wv_o = wv @ wo
    bvo = bv @ wo + bo

    # One lane-dense (H, 384) weight slab; every kernel slice is 128-lane aligned.
    w_qkv = jnp.concatenate(
        [wq, wk, wv_o, jnp.zeros((H, LANE - 3 * H), jnp.float32)], axis=1)    # (H, 128)
    w_all = jnp.concatenate(
        [w_qkv, w1, jnp.pad(wp, ((0, 0), (0, LANE - H)))], axis=1)            # (H, 384)

    def pad_row(v):
        return jnp.pad(v, ((0, 0), (0, LANE - v.shape[1])))

    # (16, 128) vector slab: H-wide params lane-0 aligned, one per sublane row.
    vec = jnp.concatenate(
        [pad_row(ln_g), pad_row(zeros_h),          # row 0/1: embedding LN gamma/beta
         pad_row(ln_g), pad_row(zeros_h),          # row 2/3: post-attention LN
         pad_row(ln_g), pad_row(zeros_h),          # row 4/5: post-FFN LN
         pad_row(b2),                              # row 6: FFN output bias
         pad_row(bp),                              # row 7: pooler bias
         jnp.concatenate([bq, bk, bvo,
                          jnp.zeros((1, LANE - 3 * H), jnp.float32)], axis=1),  # row 8
         b1,                                       # row 9: FFN intermediate bias
         jnp.zeros((6, LANE), jnp.float32)],       # rows 10-15: unused
        axis=0)                                    # (16, 128)

    return {
        "tok_emb": tok_emb,                        # (VOCAB, H)
        "pos_full": jnp.tile(pos_emb, (B, 1)),     # (BS, H), tiled once at pack time
        "w_all": w_all,                            # (H, 384)
        "w2": w2,                                  # (F, H) natural orientation
        "vec": vec,                                # (16, 128)
    }


if __name__ == "__main__":
    key = jax.random.PRNGKey(0)
    k_ids, k_params = jax.random.split(key)

    params = init_params(k_params)

    input_ids = jax.random.randint(k_ids, (B, S), 0, VOCAB, dtype=jnp.int32)
    attention_mask = jnp.array(
        [[1, 1, 1, 1, 1, 1, 1, 1],
         [1, 1, 1, 1, 1, 0, 0, 0]], dtype=jnp.int32)   # second sample padded
    dummy_tensor = jnp.zeros((1,), jnp.float32)

    pooled = dpr_wrapper_forward(input_ids, attention_mask, dummy_tensor, params)
    pooled = jax.block_until_ready(pooled)
    assert pooled.shape == (B, H) and pooled.dtype == jnp.float32
    print("KERNEL_OK")
</pallas_src>

<mosaic_0001>
module attributes {stable_mosaic.version = 11 : i64} {
  func.func @encoder_kernel(%arg0: memref<16x1xi32, #tpu.memory_space<vmem>>, %arg1: memref<1x16xi32, #tpu.memory_space<vmem>>, %arg2: memref<64x32xf32, #tpu.memory_space<vmem>>, %arg3: memref<16x32xf32, #tpu.memory_space<vmem>>, %arg4: memref<32x384xf32, #tpu.memory_space<vmem>>, %arg5: memref<128x32xf32, #tpu.memory_space<vmem>>, %arg6: memref<16x128xf32, #tpu.memory_space<vmem>>, %arg7: memref<8x128xf32, #tpu.memory_space<vmem>>) attributes {dimension_semantics = [], scalar_prefetch = 0 : i64, scratch_operands = 0 : i64, tpu.core_type = #tpu.core_type<tc>} {
    %c0 = arith.constant 0 : index
    %c0_0 = arith.constant 0 : index
    %0 = vector.load %arg0[%c0, %c0_0] : memref<16x1xi32, #tpu.memory_space<vmem>>, vector<16x1xi32>
    %c0_1 = arith.constant 0 : index
    %c0_2 = arith.constant 0 : index
    %1 = vector.load %arg1[%c0_1, %c0_2] : memref<1x16xi32, #tpu.memory_space<vmem>>, vector<1x16xi32>
    %c0_3 = arith.constant 0 : index
    %c0_4 = arith.constant 0 : index
    %2 = vector.load %arg2[%c0_3, %c0_4] : memref<64x32xf32, #tpu.memory_space<vmem>>, vector<64x32xf32>
    %c0_5 = arith.constant 0 : index
    %c0_6 = arith.constant 0 : index
    %3 = vector.load %arg3[%c0_5, %c0_6] : memref<16x32xf32, #tpu.memory_space<vmem>>, vector<16x32xf32>
    %c0_7 = arith.constant 0 : index
    %c0_8 = arith.constant 0 : index
    %4 = vector.load %arg4[%c0_7, %c0_8] : memref<32x384xf32, #tpu.memory_space<vmem>>, vector<32x384xf32>
    %c0_9 = arith.constant 0 : index
    %c0_10 = arith.constant 0 : index
    %5 = vector.load %arg5[%c0_9, %c0_10] : memref<128x32xf32, #tpu.memory_space<vmem>>, vector<128x32xf32>
    %c0_11 = arith.constant 0 : index
    %c0_12 = arith.constant 0 : index
    %6 = vector.load %arg6[%c0_11, %c0_12] : memref<16x128xf32, #tpu.memory_space<vmem>>, vector<16x128xf32>
    %7 = tpu.iota {dimensions = array<i32: 1>} : vector<16x64xi32>
    %8 = vector.broadcast %0 : vector<16x1xi32> to vector<16x64xi32>
    %9 = arith.cmpi eq, %8, %7 : vector<16x64xi32>
    %cst = arith.constant 1.000000e+00 : f32
    %cst_13 = arith.constant 0.000000e+00 : f32
    %10 = vector.broadcast %cst : f32 to vector<16x64xf32>
    %11 = vector.broadcast %cst_13 : f32 to vector<16x64xf32>
    %12 = arith.select %9, %10, %11 : vector<16x64xi1>, vector<16x64xf32>
    %cst_14 = arith.constant dense<0.000000e+00> : vector<16x32xf32>
    %13 = tpu.matmul %12, %2, %cst_14 {dimension_numbers = #tpu.dot_dimension_numbers<[1], [0], [0], [1], [0, 0, 1, 1], [], []>} : vector<16x64xf32>, vector<64x32xf32>, vector<16x32xf32> -> vector<16x32xf32>
    %14 = arith.addf %13, %3 : vector<16x32xf32>
    %15 = vector.extract_strided_slice %6 {offsets = [0, 0], sizes = [1, 32], strides = [1, 1]} : vector<16x128xf32> to vector<1x32xf32>
    %16 = vector.extract_strided_slice %6 {offsets = [1, 0], sizes = [1, 32], strides = [1, 1]} : vector<16x128xf32> to vector<1x32xf32>
    %17 = vector.extract_strided_slice %6 {offsets = [2, 0], sizes = [1, 32], strides = [1, 1]} : vector<16x128xf32> to vector<1x32xf32>
    %18 = vector.extract_strided_slice %6 {offsets = [3, 0], sizes = [1, 32], strides = [1, 1]} : vector<16x128xf32> to vector<1x32xf32>
    %19 = vector.extract_strided_slice %6 {offsets = [4, 0], sizes = [1, 32], strides = [1, 1]} : vector<16x128xf32> to vector<1x32xf32>
    %20 = vector.extract_strided_slice %6 {offsets = [5, 0], sizes = [1, 32], strides = [1, 1]} : vector<16x128xf32> to vector<1x32xf32>
    %21 = vector.extract_strided_slice %6 {offsets = [6, 0], sizes = [1, 32], strides = [1, 1]} : vector<16x128xf32> to vector<1x32xf32>
    %22 = vector.extract_strided_slice %6 {offsets = [7, 0], sizes = [1, 128], strides = [1, 1]} : vector<16x128xf32> to vector<1x128xf32>
    %23 = vector.extract_strided_slice %6 {offsets = [8, 0], sizes = [1, 128], strides = [1, 1]} : vector<16x128xf32> to vector<1x128xf32>
    %24 = vector.extract_strided_slice %6 {offsets = [9, 0], sizes = [1, 128], strides = [1, 1]} : vector<16x128xf32> to vector<1x128xf32>
    %25 = vector.extract_strided_slice %4 {offsets = [0, 0], sizes = [32, 128], strides = [1, 1]} : vector<32x384xf32> to vector<32x128xf32>
    %26 = vector.extract_strided_slice %4 {offsets = [0, 128], sizes = [32, 128], strides = [1, 1]} : vector<32x384xf32> to vector<32x128xf32>
    %27 = vector.extract_strided_slice %4 {offsets = [0, 256], sizes = [32, 128], strides = [1, 1]} : vector<32x384xf32> to vector<32x128xf32>
    %cst_15 = arith.constant dense<0.000000e+00> : vector<16xf32>
    %28 = vector.multi_reduction <add>, %14, %cst_15 [1] : vector<16x32xf32> to vector<16xf32>
    %29 = vector.shape_cast %28 : vector<16xf32> to vector<16x1xf32>
    %cst_16 = arith.constant 3.200000e+01 : f32
    %30 = vector.broadcast %cst_16 : f32 to vector<16x1xf32>
    %31 = arith.divf %29, %30 : vector<16x1xf32>
    %32 = arith.mulf %14, %14 : vector<16x32xf32>
    %cst_17 = arith.constant dense<0.000000e+00> : vector<16xf32>
    %33 = vector.multi_reduction <add>, %32, %cst_17 [1] : vector<16x32xf32> to vector<16xf32>
    %34 = vector.shape_cast %33 : vector<16xf32> to vector<16x1xf32>
    %cst_18 = arith.constant 3.200000e+01 : f32
    %35 = vector.broadcast %cst_18 : f32 to vector<16x1xf32>
    %36 = arith.divf %34, %35 : vector<16x1xf32>
    %37 = arith.mulf %31, %31 : vector<16x1xf32>
    %38 = arith.subf %36, %37 : vector<16x1xf32>
    %39 = vector.broadcast %31 : vector<16x1xf32> to vector<16x32xf32>
    %40 = arith.subf %14, %39 : vector<16x32xf32>
    %cst_19 = arith.constant 9.99999996E-13 : f32
    %41 = vector.broadcast %cst_19 : f32 to vector<16x1xf32>
    %42 = arith.addf %38, %41 : vector<16x1xf32>
    %43 = math.rsqrt %42 : vector<16x1xf32>
    %44 = vector.broadcast %43 : vector<16x1xf32> to vector<16x32xf32>
    %45 = arith.mulf %40, %44 : vector<16x32xf32>
    %46 = vector.broadcast %15 : vector<1x32xf32> to vector<16x32xf32>
    %47 = arith.mulf %45, %46 : vector<16x32xf32>
    %48 = vector.broadcast %16 : vector<1x32xf32> to vector<16x32xf32>
    %49 = arith.addf %47, %48 : vector<16x32xf32>
    %cst_20 = arith.constant dense<0.000000e+00> : vector<16x128xf32>
    %50 = tpu.matmul %49, %25, %cst_20 {dimension_numbers = #tpu.dot_dimension_numbers<[1], [0], [0], [1], [0, 0, 1, 1], [], []>} : vector<16x32xf32>, vector<32x128xf32>, vector<16x128xf32> -> vector<16x128xf32>
    %51 = vector.broadcast %23 : vector<1x128xf32> to vector<16x128xf32>
    %52 = arith.addf %50, %51 : vector<16x128xf32>
    %53 = vector.extract_strided_slice %52 {offsets = [0, 0], sizes = [16, 32], strides = [1, 1]} : vector<16x128xf32> to vector<16x32xf32>
    %54 = vector.extract_strided_slice %52 {offsets = [0, 32], sizes = [16, 32], strides = [1, 1]} : vector<16x128xf32> to vector<16x32xf32>
    %55 = vector.extract_strided_slice %52 {offsets = [0, 64], sizes = [16, 32], strides = [1, 1]} : vector<16x128xf32> to vector<16x32xf32>
    %56 = tpu.iota {dimensions = array<i32: 0>} : vector<16x16xi32>
    %c3_i32 = arith.constant 3 : i32
    %57 = vector.broadcast %c3_i32 : i32 to vector<16x16xi32>
    %58 = arith.shrsi %56, %57 : vector<16x16xi32>
    %59 = tpu.iota {dimensions = array<i32: 1>} : vector<16x16xi32>
    %c3_i32_21 = arith.constant 3 : i32
    %60 = vector.broadcast %c3_i32_21 : i32 to vector<16x16xi32>
    %61 = arith.shrsi %59, %60 : vector<16x16xi32>
    %62 = arith.cmpi eq, %58, %61 : vector<16x16xi32>
    %c0_i32 = arith.constant 0 : i32
    %63 = vector.broadcast %c0_i32 : i32 to vector<1x16xi32>
    %64 = arith.cmpi sgt, %1, %63 : vector<1x16xi32>
    %65 = vector.broadcast %64 : vector<1x16xi1> to vector<16x16xi1>
    %66 = arith.andi %62, %65 : vector<16x16xi1>
    %cst_22 = arith.constant dense<0.000000e+00> : vector<16x16xf32>
    %67 = tpu.matmul %53, %54, %cst_22 {dimension_numbers = #tpu.dot_dimension_numbers<[1], [1], [0], [0], [0, 0, 1, 0], [], []>} : vector<16x32xf32>, vector<16x32xf32>, vector<16x16xf32> -> vector<16x16xf32>
    %cst_23 = arith.constant 0.176776692 : f32
    %68 = vector.broadcast %cst_23 : f32 to vector<16x16xf32>
    %69 = arith.mulf %67, %68 : vector<16x16xf32>
    %cst_24 = arith.constant -1.000000e+09 : f32
    %70 = vector.broadcast %cst_24 : f32 to vector<16x16xf32>
    %71 = arith.select %66, %69, %70 : vector<16x16xi1>, vector<16x16xf32>
    %cst_25 = arith.constant dense<0xFF800000> : vector<16xf32>
    %72 = vector.multi_reduction <maximumf>, %71, %cst_25 [1] : vector<16x16xf32> to vector<16xf32>
    %73 = vector.shape_cast %72 : vector<16xf32> to vector<16x1xf32>
    %74 = vector.broadcast %73 : vector<16x1xf32> to vector<16x16xf32>
    %75 = arith.subf %71, %74 : vector<16x16xf32>
    %76 = math.exp %75 : vector<16x16xf32>
    %cst_26 = arith.constant dense<0.000000e+00> : vector<16xf32>
    %77 = vector.multi_reduction <add>, %76, %cst_26 [1] : vector<16x16xf32> to vector<16xf32>
    %78 = vector.shape_cast %77 : vector<16xf32> to vector<16x1xf32>
    %79 = tpu.reciprocal %78 {approx = true} : vector<16x1xf32> -> vector<16x1xf32>
    %80 = vector.broadcast %79 : vector<16x1xf32> to vector<16x16xf32>
    %81 = arith.mulf %76, %80 : vector<16x16xf32>
    %cst_27 = arith.constant dense<0.000000e+00> : vector<16x32xf32>
    %82 = tpu.matmul %81, %55, %cst_27 {dimension_numbers = #tpu.dot_dimension_numbers<[1], [0], [0], [1], [0, 0, 1, 1], [], []>} : vector<16x16xf32>, vector<16x32xf32>, vector<16x32xf32> -> vector<16x32xf32>
    %83 = arith.addf %49, %82 : vector<16x32xf32>
    %cst_28 = arith.constant dense<0.000000e+00> : vector<16xf32>
    %84 = vector.multi_reduction <add>, %83, %cst_28 [1] : vector<16x32xf32> to vector<16xf32>
    %85 = vector.shape_cast %84 : vector<16xf32> to vector<16x1xf32>
    %cst_29 = arith.constant 3.200000e+01 : f32
    %86 = vector.broadcast %cst_29 : f32 to vector<16x1xf32>
    %87 = arith.divf %85, %86 : vector<16x1xf32>
    %88 = arith.mulf %83, %83 : vector<16x32xf32>
    %cst_30 = arith.constant dense<0.000000e+00> : vector<16xf32>
    %89 = vector.multi_reduction <add>, %88, %cst_30 [1] : vector<16x32xf32> to vector<16xf32>
    %90 = vector.shape_cast %89 : vector<16xf32> to vector<16x1xf32>
    %cst_31 = arith.constant 3.200000e+01 : f32
    %91 = vector.broadcast %cst_31 : f32 to vector<16x1xf32>
    %92 = arith.divf %90, %91 : vector<16x1xf32>
    %93 = arith.mulf %87, %87 : vector<16x1xf32>
    %94 = arith.subf %92, %93 : vector<16x1xf32>
    %95 = vector.broadcast %87 : vector<16x1xf32> to vector<16x32xf32>
    %96 = arith.subf %83, %95 : vector<16x32xf32>
    %cst_32 = arith.constant 9.99999996E-13 : f32
    %97 = vector.broadcast %cst_32 : f32 to vector<16x1xf32>
    %98 = arith.addf %94, %97 : vector<16x1xf32>
    %99 = math.rsqrt %98 : vector<16x1xf32>
    %100 = vector.broadcast %99 : vector<16x1xf32> to vector<16x32xf32>
    %101 = arith.mulf %96, %100 : vector<16x32xf32>
    %102 = vector.broadcast %17 : vector<1x32xf32> to vector<16x32xf32>
    %103 = arith.mulf %101, %102 : vector<16x32xf32>
    %104 = vector.broadcast %18 : vector<1x32xf32> to vector<16x32xf32>
    %105 = arith.addf %103, %104 : vector<16x32xf32>
    %cst_33 = arith.constant dense<0.000000e+00> : vector<16x128xf32>
    %106 = tpu.matmul %105, %26, %cst_33 {dimension_numbers = #tpu.dot_dimension_numbers<[1], [0], [0], [1], [0, 0, 1, 1], [], []>} : vector<16x32xf32>, vector<32x128xf32>, vector<16x128xf32> -> vector<16x128xf32>
    %107 = vector.broadcast %24 : vector<1x128xf32> to vector<16x128xf32>
    %108 = arith.addf %106, %107 : vector<16x128xf32>
    %109 = arith.mulf %108, %108 : vector<16x128xf32>
    %110 = arith.mulf %108, %109 : vector<16x128xf32>
    %cst_34 = arith.constant 4.471500e-02 : f32
    %111 = vector.broadcast %cst_34 : f32 to vector<16x128xf32>
    %112 = arith.mulf %111, %110 : vector<16x128xf32>
    %113 = arith.addf %108, %112 : vector<16x128xf32>
    %cst_35 = arith.constant 0.797884583 : f32
    %114 = vector.broadcast %cst_35 : f32 to vector<16x128xf32>
    %115 = arith.mulf %114, %113 : vector<16x128xf32>
    %116 = math.tanh %115 : vector<16x128xf32>
    %cst_36 = arith.constant 1.000000e+00 : f32
    %117 = vector.broadcast %cst_36 : f32 to vector<16x128xf32>
    %118 = arith.addf %117, %116 : vector<16x128xf32>
    %cst_37 = arith.constant 5.000000e-01 : f32
    %119 = vector.broadcast %cst_37 : f32 to vector<16x128xf32>
    %120 = arith.mulf %119, %118 : vector<16x128xf32>
    %121 = arith.mulf %108, %120 : vector<16x128xf32>
    %cst_38 = arith.constant dense<0.000000e+00> : vector<16x32xf32>
    %122 = tpu.matmul %121, %5, %cst_38 {dimension_numbers = #tpu.dot_dimension_numbers<[1], [0], [0], [1], [0, 0, 1, 1], [], []>} : vector<16x128xf32>, vector<128x32xf32>, vector<16x32xf32> -> vector<16x32xf32>
    %123 = vector.broadcast %21 : vector<1x32xf32> to vector<16x32xf32>
    %124 = arith.addf %122, %123 : vector<16x32xf32>
    %125 = arith.addf %105, %124 : vector<16x32xf32>
    %cst_39 = arith.constant dense<0.000000e+00> : vector<16xf32>
    %126 = vector.multi_reduction <add>, %125, %cst_39 [1] : vector<16x32xf32> to vector<16xf32>
    %127 = vector.shape_cast %126 : vector<16xf32> to vector<16x1xf32>
    %cst_40 = arith.constant 3.200000e+01 : f32
    %128 = vector.broadcast %cst_40 : f32 to vector<16x1xf32>
    %129 = arith.divf %127, %128 : vector<16x1xf32>
    %130 = arith.mulf %125, %125 : vector<16x32xf32>
    %cst_41 = arith.constant dense<0.000000e+00> : vector<16xf32>
    %131 = vector.multi_reduction <add>, %130, %cst_41 [1] : vector<16x32xf32> to vector<16xf32>
    %132 = vector.shape_cast %131 : vector<16xf32> to vector<16x1xf32>
    %cst_42 = arith.constant 3.200000e+01 : f32
    %133 = vector.broadcast %cst_42 : f32 to vector<16x1xf32>
    %134 = arith.divf %132, %133 : vector<16x1xf32>
    %135 = arith.mulf %129, %129 : vector<16x1xf32>
    %136 = arith.subf %134, %135 : vector<16x1xf32>
    %137 = vector.broadcast %129 : vector<16x1xf32> to vector<16x32xf32>
    %138 = arith.subf %125, %137 : vector<16x32xf32>
    %cst_43 = arith.constant 9.99999996E-13 : f32
    %139 = vector.broadcast %cst_43 : f32 to vector<16x1xf32>
    %140 = arith.addf %136, %139 : vector<16x1xf32>
    %141 = math.rsqrt %140 : vector<16x1xf32>
    %142 = vector.broadcast %141 : vector<16x1xf32> to vector<16x32xf32>
    %143 = arith.mulf %138, %142 : vector<16x32xf32>
    %144 = vector.broadcast %19 : vector<1x32xf32> to vector<16x32xf32>
    %145 = arith.mulf %143, %144 : vector<16x32xf32>
    %146 = vector.broadcast %20 : vector<1x32xf32> to vector<16x32xf32>
    %147 = arith.addf %145, %146 : vector<16x32xf32>
    %cst_44 = arith.constant dense<0.000000e+00> : vector<16x128xf32>
    %148 = tpu.matmul %147, %27, %cst_44 {dimension_numbers = #tpu.dot_dimension_numbers<[1], [0], [0], [1], [0, 0, 1, 1], [], []>} : vector<16x32xf32>, vector<32x128xf32>, vector<16x128xf32> -> vector<16x128xf32>
    %149 = vector.broadcast %22 : vector<1x128xf32> to vector<16x128xf32>
    %150 = arith.addf %148, %149 : vector<16x128xf32>
    %151 = math.tanh %150 : vector<16x128xf32>
    %cst_45 = arith.constant 0.000000e+00 : f32
    %152 = vector.broadcast %cst_45 : f32 to vector<8x128xf32>
    %c0_46 = arith.constant 0 : index
    %c0_47 = arith.constant 0 : index
    %153 = vector.load %arg7[%c0_46, %c0_47] : memref<8x128xf32, #tpu.memory_space<vmem>>, vector<8x128xf32>
    tpu.vector_store %arg7[%c0_46, %c0_47], %152 {strides = array<i32>} : memref<8x128xf32, #tpu.memory_space<vmem>>, vector<8x128xf32>,
    %154 = vector.extract_strided_slice %151 {offsets = [0, 0], sizes = [1, 128], strides = [1, 1]} : vector<16x128xf32> to vector<1x128xf32>
    %c0_48 = arith.constant 0 : index
    %c0_49 = arith.constant 0 : index
    %155 = vector.load %arg7[%c0_48, %c0_49] : memref<8x128xf32, #tpu.memory_space<vmem>>, vector<1x128xf32>
    tpu.vector_store %arg7[%c0_48, %c0_49], %154 {strides = array<i32>} : memref<8x128xf32, #tpu.memory_space<vmem>>, vector<1x128xf32>,
    %156 = vector.extract_strided_slice %151 {offsets = [8, 0], sizes = [1, 128], strides = [1, 1]} : vector<16x128xf32> to vector<1x128xf32>
    %c1 = arith.constant 1 : index
    %c0_50 = arith.constant 0 : index
    %157 = vector.load %arg7[%c1, %c0_50] : memref<8x128xf32, #tpu.memory_space<vmem>>, vector<1x128xf32>
    tpu.vector_store %arg7[%c1, %c0_50], %156 {strides = array<i32>} : memref<8x128xf32, #tpu.memory_space<vmem>>, vector<1x128xf32>,
    return
  }
}

</mosaic_0001>

<bundles_post_ra>
// kernel: tpu_custom_call.1
= control target key start
LH: loop header
LB: loop body
LE: loop exit
PB: predicated region body
PF: predicated region fallthrough
CT: control target
= control target key end

     0   :  { %v1206_v1 = vmov 0   ;;  %s1473_s0 = inlined_call_operand.vmem [shape: s32[16,1], index: 0, kind: input, shape index: {}]   ;;  %s1474_s1 = inlined_call_operand.vmem [shape: s32[1,16], index: 1, kind: input, shape index: {}]   ;;  %s1475_s2 = inlined_call_operand.vmem [shape: f32[64,32], index: 2, kind: input, shape index: {}]   ;;  %s1476_s3 = inlined_call_operand.vmem [shape: f32[16,32], index: 3, kind: input, shape index: {}]   ;;  %s1477_s4 = inlined_call_operand.vmem [shape: f32[32,384], index: 4, kind: input, shape index: {}]   ;;  %s1478_s5 = inlined_call_operand.vmem [shape: f32[128,32], index: 5, kind: input, shape index: {}]   ;;  %s1479_s6 = inlined_call_operand.vmem [shape: f32[16,128], index: 6, kind: input, shape index: {}]   ;;  %s1480_s7 = inlined_call_operand.hbm [shape: f32[8,128], index: 7, kind: output, shape index: {}]  }
   0x1   :  { %v27_v0 = vld [vmem:[%s1473_s0] sm:$0xff]  ;;  %1143 = vset.pattern.permute.xlu0 %v1206_v1  ;;  %v31_v3 = vld [vmem:[%s1475_s2 + $0x8] sm:$0xff]  ;;  %v32_v4 = vld [vmem:[%s1475_s2 + $0x10] sm:$0xff] }
   0x2   :  { %v30_v2 = vld [vmem:[%s1475_s2] sm:$0xff]  ;;  %73 = vperm.xlu0 %1143, %v27_v0   ;;  %v28_v5 = vld [vmem:[%s1473_s0 + $0x8] sm:$0xff]  ;;  %v33_v7 = vld [vmem:[%s1475_s2 + $0x18] sm:$0xff] }
   0x3   :  { %v1056_v6 = vpack.c.bf16 %v31_v3, %v30_v2  ;;  %v1060_v8 = vpack.c.bf16 %v33_v7, %v32_v4  ;;  %v34_v9 = vld [vmem:[%s1475_s2 + $0x20] sm:$0xff]  ;;  %v35_v10 = vld [vmem:[%s1475_s2 + $0x28] sm:$0xff] }
   0x4   :  { %12 = vsyncpa [#allocation3], 0  ;;  %v1207_v11 = vmov 0.0   ;;  %v1064_v12 = vpack.c.bf16 %v35_v10, %v34_v9  ;;  %v36_v13 = vld [vmem:[%s1475_s2 + $0x30] sm:$0xff]  ;;  %v37_v14 = vld [vmem:[%s1475_s2 + $0x38] sm:$0xff]  ;;  %v70_v16 = vlaneseq  ;;  %vm82_vm0 = vcmask 523264  }
   0x5   :  { %1057 = vmatprep.subr.bf16.mxu1 %v1056_v6  ;;  %870 = vst [vmem:[#allocation2] sm:$0xff] %v1207_v11  ;;  %v1068_v15 = vpack.c.bf16 %v37_v14, %v36_v13  ;;  %v39_v22 = vld [vmem:[%s1476_s3 + $0x8] sm:$0xff]  ;;  %v38_v23 = vld [vmem:[%s1476_s3] sm:$0xff]  ;;  %vm164_vm3 = vcmask 261120   ;;  %v43_v35 = vld [vmem:[%s1477_s4 + $0x18] sm:$0xff]  ;;  %s1208_s11 = smov 96  }
   0x6   :  { %1059 = vmatpush3.bf16.msra.mxu1 %v1056_v6  ;;  %76 = vperm.xlu0 %1143, %v28_v5   ;;  %v1282_v17 = vand.u32 127, %v70_v16  ;;  %v40_v34 = vld [vmem:[%s1477_s4] sm:$0xff]  ;;  %v46_v37 = vld [vmem:[%s1477_s4 + $0x30] sm:$0xff]  ;;  %v49_v38 = vld [vmem:[%s1477_s4 + $0x48] sm:$0xff]  ;;  %v1308_v54 = vshrl.u32 %v70_v16, 7  ;;  %vm403_vm10 = vcmask 130048  }
   0x7   :  { %1061 = vmatprep.subr.bf16.mxu1 %v1060_v8  ;;  %v1072_v36 = vpack.c.bf16 %v43_v35, %v40_v34  ;;  %v1076_v39 = vpack.c.bf16 %v49_v38, %v46_v37  ;;  %v1314_v56 = vld [vmem:[%s1479_s6] sm:$0xff]  ;;  %v1332_v7 = vld [vmem:[%s1479_s6 + $0x8] sm:$0xff]  ;;  %vm1081_vm4 = vmpackc.low %vm164_vm3, %vm164_vm3 }
   0x8   :  { %v198_v55 = vsub.s32 0, %v1308_v54  ;;  %v204_v57 = vsub.s32 1, %v1308_v54 }
   0x9   :  { %1073 = vmatprep.subr.bf16.mxu0 %v1072_v36 }
   0xa   :  { %1063 = vmatpush3.bf16.msra.mxu1 %v1060_v8  ;;  %1075 = vmatpush3.bf16.msra.mxu0 %v1072_v36  ;;  %v199_v59 = vrot.slane %v1314_v56, %v198_v55  ;;  %v205_v63 = vrot.slane %v1314_v56, %v204_v57  ;;  %v211_v8 = vrot.slane %v1332_v7, %v198_v55 }
   0xb   :  { %1065 = vmatprep.subr.bf16.mxu1 %v1064_v12  ;;  %1077 = vmatprep.subr.bf16.mxu0 %v1076_v39 }
   0xe   :  { %1067 = vmatpush3.bf16.msra.mxu1 %v1064_v12  ;;  %1079 = vmatpush3.bf16.msra.mxu0 %v1076_v39 }
   0xf   :  { %1069 = vmatprep.subr.bf16.mxu1 %v1068_v15 }
  0x12   :  { %1071 = vmatpush3.bf16.msra.mxu1 %v1068_v15 }
  0x81   :  { %v74_v18 = vpop.permute.xlu0 %73 }
  0x82   :  { %vm78_vm1 = vcmp.eq.s32.totalorder %v74_v18, %v1282_v17 }
  0x83   :  { %v80_v19 = vsel %vm78_vm1, 1.0, %v1207_v11 }
  0x84   :  { %971 = vmatprep.mubr.msk.f32.mxu1 %vm82_vm0, %v80_v19  ;;  %v29_v19 = vld [vmem:[%s1474_s1] sm:$0x1]  ;;  %s1209_s1 = smov 64  }
  0x85   :  { %v77_v20 = vpop.permute.xlu0 %76  ;;  %vm301_vm5 = vcmp.gt.s32.totalorder %v29_v19, 0 }
  0x86   :  { %vm79_vm2 = vcmp.eq.s32.totalorder %v77_v20, %v1282_v17  ;;  %v295_v20 = vadd.s32 8, %v1308_v54 }
  0x87   :  { %v81_v21 = vsel %vm79_vm2, 1.0, %v1207_v11 }
  0x88   :  { %972 = vmatmul.mubr.msk.f32.vlgmr.msra.gmra.mrb[0].mxu1 %vm82_vm0, %v81_v21  ;;  %v302_v21 = vsel %vm301_vm5, 1, %v1206_v1 }
 0x15b   :  { %v973_v24 = vpop.f32.mrb[0].mxu1 }
 0x15c   :  { %v161_v25 = vadd.f32 %v973_v24, %v39_v22  ;;  %v155_v26 = vpop.f32.mrb[1].mxu1  ;;  %v306_v22 = vrot.slane %v302_v21, %v198_v55  ;;  %v298_v24 = vshra.s32 %v1282_v17, 3 }
 0x15d   :  { %v156_v27 = vadd.f32 %v155_v26, %v38_v23  ;;  %v297_v23 = vshra.s32 %v295_v20, 3 }
 0x15e   :  { %v168_v28 = vsel %vm164_vm3, %v161_v25, 0.0  ;;  %v175_v32 = vmul.f32 %v161_v25, %v161_v25  ;;  %vm307_vm6 = vcmp.eq.s32.totalorder %v306_v22, 1 }
 0x15f   :  { %169 = vadd.xlane.f32.xlu1 %v168_v28  ;;  %v174_v29 = vmul.f32 %v156_v27, %v156_v27  ;;  %v165_v31 = vsel %vm164_vm3, %v156_v27, 0.0  ;;  %vm300_vm7 = vcmp.eq.s32.totalorder %v297_v23, %v298_v24 }
 0x160   :  { %v179_v33 = vsel %vm164_vm3, %v175_v32, 0.0  ;;  %vm309_vm9 = vmand %vm300_vm7, %vm307_vm6 }
 0x161   :  { %v176_v30 = vsel %vm164_vm3, %v174_v29, 0.0 }
 0x162   :  { %177 = vadd.xlane.f32.xlu0 %v176_v30 }
 0x163   :  { %166 = vadd.xlane.f32.xlu1 %v165_v31 }
 0x167   :  { %180 = vadd.xlane.f32.xlu1 %v179_v33 }
 0x1ec   :  { %v170_v40 = vpop.xlane.xlu1 %169 }
 0x1ed   :  { %v173_v43 = vmul.f32 0.03125, %v170_v40 }
 0x1ef   :  { %v178_v41 = vpop.xlane.xlu0 %177  ;;  %v185_v48 = vmul.f32 %v173_v43, %v173_v43  ;;  %v189_v61 = vsub.f32 %v161_v25, %v173_v43  ;;  %v296_v25 = vshra.s32 %v1308_v54, 3 }
 0x1f0   :  { %v167_v42 = vpop.xlane.xlu1 %166  ;;  %v182_v45 = vmul.f32 0.03125, %v178_v41 }
 0x1f1   :  { %v172_v44 = vmul.f32 0.03125, %v167_v42  ;;  %vm299_vm8 = vcmp.eq.s32.totalorder %v296_v25, %v298_v24  ;;  %v547_v24 = vsub.s32 2, %v1308_v54  ;;  %v553_v25 = vsub.s32 3, %v1308_v54 }
 0x1f2   :  { %vm308_vm11 = vmand %vm299_vm8, %vm307_vm6 }
 0x1f3   :  { %v184_v46 = vmul.f32 %v172_v44, %v172_v44  ;;  %v188_v58 = vsub.f32 %v156_v27, %v172_v44 }
 0x1f4   :  { %v181_v47 = vpop.xlane.xlu1 %180 }
 0x1f5   :  { %v186_v49 = vsub.f32 %v182_v45, %v184_v46  ;;  %v183_v50 = vmul.f32 0.03125, %v181_v47 }
 0x1f7   :  { %v190_v51 = vadd.f32 1e-12, %v186_v49  ;;  %v187_v52 = vsub.f32 %v183_v50, %v185_v48 }
 0x1f9   :  { %1154 = vrsqrt.f32 %v190_v51  ;;  %v191_v53 = vadd.f32 1e-12, %v187_v52 }
 0x1fb   :  { %1156 = vrsqrt.f32 %v191_v53 }
 0x203   :  { %v1155_v60 = vpop.eup %1154 }
 0x204   :  { %v194_v62 = vmul.f32 %v1155_v60, %v188_v58 }
 0x205   :  { %v1157_v0 = vpop.eup %1156 }
 0x206   :  { %v195_v2 = vmul.f32 %v1157_v0, %v189_v61  ;;  %v200_v3 = vmul.f32 %v199_v59, %v194_v62 }
 0x208   :  { %v201_v4 = vmul.f32 %v199_v59, %v195_v2  ;;  %v1321_v5 = vadd.f32 %v205_v63, %v200_v3  ;;  %v41_v2 = vld [vmem:[%s1477_s4 + $0x8] sm:$0xff]  ;;  %v44_v3 = vld [vmem:[%s1477_s4 + $0x20] sm:$0xff] }
 0x20a   :  { %v1323_v6 = vadd.f32 %v205_v63, %v201_v4  ;;  %982 = vmatprep.mubr.msk.f32.mxu0 %vm164_vm3, %v1321_v5  ;;  %v1090_v4 = vpack.c.bf16 %v44_v3, %v41_v2 }
 0x20c   :  { %983 = vmatmul.mubr.msk.f32.vlgmr.msra.gmra.mrb[0].mxu0 %vm164_vm3, %v1323_v6 }
 0x2df   :  { %v984_v9 = vpop.f32.mrb[0].mxu0 }
 0x2e0   :  { %v290_v10 = vadd.f32 %v984_v9, %v211_v8  ;;  %v284_v11 = vpop.f32.mrb[1].mxu0 }
 0x2e1   :  { %v285_v12 = vadd.f32 %v284_v11, %v211_v8 }
 0x2e3   :  { %989 = vmatprep.mubr.msk.f32.mxu1 %vm164_vm3, %v285_v12  ;;  %v1144_v13 = vpack.i.bf16 %v290_v10, %v285_v12 }
 0x2e5   :  { %1145 = vrot.lane.b32.xlu1 %v1144_v13, %s1208_s11 }
 0x357   :  { %v1146_v14 = vpop.permute.xlu1 %1145 }
 0x358   :  { %v1148_v15 = vunpack.i.h.bf16 %v1146_v14  ;;  %v1147_v16 = vunpack.i.l.bf16 %v1146_v14 }
 0x35a   :  { %v1080_v18 = vpack.c.bf16 %v1148_v15, %v1147_v16 }
 0x35c   :  { %1082 = vmatprep.subr.msk.bf16.mxu1 %vm1081_vm4, %v1080_v18 }
 0x35d   :  { %1085 = vmatpush3.bf16.xpose.msk.msra.mxu1 %vm1081_vm4, %v1080_v18 }
 0x35e   :  { %1091 = vmatprep.subr.bf16.mxu1 %v1090_v4 }
 0x364   :  { %990 = vmatmul.mubr.msk.f32.vlgmr.msra.gmra.mrb[2].mxu1 %vm164_vm3, %v290_v10 }
 0x365   :  { %1093 = vmatpush3.bf16.msra.mxu1 %v1090_v4 }
 0x437   :  { %v991_v26 = vpop.f32.mrb[2].mxu1 }
 0x438   :  { %v400_v27 = vmul.f32 0.17677669, %v991_v26  ;;  %v390_v28 = vpop.f32.mrb[3].mxu1  ;;  %v548_v26 = vrot.slane %v1314_v56, %v547_v24 }
 0x439   :  { %v399_v29 = vmul.f32 0.17677669, %v390_v28 }
 0x43a   :  { %v402_v30 = vsel %vm309_vm9, %v400_v27, -1e+09 }
 0x43b   :  { %v407_v31 = vsel %vm403_vm10, %v402_v30, -inf  ;;  %v401_v1 = vsel %vm308_vm11, %v399_v29, -1e+09 }
 0x43c   :  { %408 = vmax.xlane.f32.xlu0 %v407_v31  ;;  %v404_v32 = vsel %vm403_vm10, %v401_v1, -inf  ;;  %v554_v31 = vrot.slane %v1314_v56, %v553_v25 }
 0x43d   :  { %405 = vmax.xlane.f32.xlu1 %v404_v32 }
 0x4c9   :  { %v409_v17 = vpop.xlane.xlu0 %408 }
 0x4ca   :  { %v411_v33 = vsub.f32 %v402_v30, %v409_v17  ;;  %v406_v34 = vpop.xlane.xlu1 %405 }
 0x4cb   :  { %v410_v35 = vsub.f32 %v401_v1, %v406_v34 }
 0x4cc   :  { %v414_v36 = vmul.f32 1.442695, %v411_v33 }
 0x4cd   :  { %v412_v37 = vmul.f32 1.442695, %v410_v35 }
 0x4ce   :  { %1158 = vpow2.f32 %v414_v36  ;;  %v52_v36 = vld [vmem:[%s1478_s5] sm:$0xff] }
 0x4cf   :  { %1160 = vpow2.f32 %v412_v37  ;;  %v53_v37 = vld [vmem:[%s1478_s5 + $0x8] sm:$0xff] }
 0x4d8   :  { %v1159_v38 = vpop.eup %1158 }
 0x4d9   :  { %v419_v39 = vsel %vm403_vm10, %v1159_v38, 0.0  ;;  %v1161_v40 = vpop.eup %1160 }
 0x4da   :  { %420 = vadd.xlane.f32.xlu0 %v419_v39  ;;  %v416_v41 = vsel %vm403_vm10, %v1161_v40, 0.0  ;;  %v54_v39 = vld [vmem:[%s1478_s5 + $0x10] sm:$0xff] }
 0x4de   :  { %417 = vadd.xlane.f32.xlu0 %v416_v41 }
 0x4f4   :  { %1150 = vrot.lane.b32.xlu0 %v1144_v13, %s1209_s1 }
 0x567   :  { %v421_v42 = vpop.xlane.xlu0 %420 }
 0x568   :  { %1162 = vrcp.f32 %v421_v42  ;;  %v56_v42 = vld [vmem:[%s1478_s5 + $0x20] sm:$0xff] }
 0x56b   :  { %v418_v43 = vpop.xlane.xlu0 %417 }
 0x56c   :  { %1164 = vrcp.f32 %v418_v43  ;;  %v57_v43 = vld [vmem:[%s1478_s5 + $0x28] sm:$0xff] }
 0x56f   :  { %v1151_v44 = vpop.permute.xlu0 %1150 }
 0x570   :  { %v1153_v45 = vunpack.i.h.bf16 %v1151_v44  ;;  %v1152_v46 = vunpack.i.l.bf16 %v1151_v44  ;;  %v1106_v44 = vpack.c.bf16 %v57_v43, %v56_v42 }
 0x572   :  { %v1086_v47 = vpack.c.bf16 %v1153_v45, %v1152_v46  ;;  %v1163_v48 = vpop.eup %1162  ;;  %v58_v45 = vld [vmem:[%s1478_s5 + $0x30] sm:$0xff]  ;;  %v59_v46 = vld [vmem:[%s1478_s5 + $0x38] sm:$0xff] }
 0x573   :  { %v425_v51 = vmul.f32 %v1163_v48, %v1159_v38  ;;  %v1098_v38 = vpack.c.bf16 %v53_v37, %v52_v36  ;;  %v60_v48 = vld [vmem:[%s1478_s5 + $0x40] sm:$0xff] }
 0x574   :  { %1087 = vmatprep.subr.bf16.mxu0 %v1086_v47 }
 0x575   :  { %1089 = vmatpush3.bf16.msra.mxu0 %v1086_v47  ;;  %v1110_v47 = vpack.c.bf16 %v59_v46, %v58_v45 }
 0x576   :  { %v1165_v49 = vpop.eup %1164  ;;  %1099 = vmatprep.subr.bf16.mxu0 %v1098_v38 }
 0x577   :  { %v424_v50 = vmul.f32 %v1165_v49, %v1161_v40  ;;  %v55_v40 = vld [vmem:[%s1478_s5 + $0x18] sm:$0xff]  ;;  %v61_v49 = vld [vmem:[%s1478_s5 + $0x48] sm:$0xff] }
 0x578   :  { %v1102_v41 = vpack.c.bf16 %v55_v40, %v54_v39  ;;  %v51_v39 = vld [vmem:[%s1477_s4 + $0x58] sm:$0xff] }
 0x579   :  { %996 = vmatprep.mubr.msk.f32.mxu0 %vm403_vm10, %v424_v50  ;;  %v62_v50 = vld [vmem:[%s1478_s5 + $0x50] sm:$0xff] }
 0x57a   :  { %997 = vmatmul.mubr.msk.f32.vlgmr.msra.gmra.mrb[2].mxu0 %vm403_vm10, %v425_v51  ;;  %v1114_v51 = vpack.c.bf16 %v61_v49, %v60_v48 }
 0x57b   :  { %1101 = vmatpush3.bf16.msra.mxu0 %v1098_v38  ;;  %v48_v38 = vld [vmem:[%s1477_s4 + $0x40] sm:$0xff] }
 0x57c   :  { %1103 = vmatprep.subr.bf16.mxu0 %v1102_v41  ;;  %v1134_v40 = vpack.c.bf16 %v51_v39, %v48_v38 }
 0x57f   :  { %1105 = vmatpush3.bf16.msra.mxu0 %v1102_v41 }
 0x580   :  { %1107 = vmatprep.subr.bf16.mxu0 %v1106_v44 }
 0x583   :  { %1109 = vmatpush3.bf16.msra.mxu0 %v1106_v44 }
 0x584   :  { %1111 = vmatprep.subr.bf16.mxu0 %v1110_v47 }
 0x587   :  { %1113 = vmatpush3.bf16.msra.mxu0 %v1110_v47 }
 0x588   :  { %1115 = vmatprep.subr.bf16.mxu0 %v1114_v51 }
 0x58b   :  { %1117 = vmatpush3.bf16.msra.mxu0 %v1114_v51 }
 0x64d   :  { %v998_v52 = vpop.f32.mrb[2].mxu0 }
 0x64e   :  { %v514_v53 = vadd.f32 %v998_v52, %v1323_v6  ;;  %v504_v55 = vpop.f32.mrb[3].mxu0  ;;  %v50_v6 = vld [vmem:[%s1477_s4 + $0x50] sm:$0xff]  ;;  %v63_v52 = vld [vmem:[%s1478_s5 + $0x58] sm:$0xff] }
 0x64f   :  { %v513_v58 = vadd.f32 %v504_v55, %v1321_v5  ;;  %v47_v5 = vld [vmem:[%s1477_s4 + $0x38] sm:$0xff]  ;;  %v64_v55 = vld [vmem:[%s1478_s5 + $0x60] sm:$0xff] }
 0x650   :  { %v518_v59 = vsel %vm164_vm3, %v514_v53, 0.0  ;;  %v524_v63 = vmul.f32 %v514_v53, %v514_v53  ;;  %v1094_v8 = vpack.c.bf16 %v50_v6, %v47_v5 }
 0x651   :  { %519 = vadd.xlane.f32.xlu1 %v518_v59  ;;  %v523_v60 = vmul.f32 %v513_v58, %v513_v58  ;;  %v515_v62 = vsel %vm164_vm3, %v513_v58, 0.0 }
 0x652   :  { %v528_v0 = vsel %vm164_vm3, %v524_v63, 0.0  ;;  %1095 = vmatprep.subr.bf16.mxu1 %v1094_v8  ;;  %v560_v63 = vrot.slane %v1332_v7, %v204_v57 }
 0x653   :  { %v525_v61 = vsel %vm164_vm3, %v523_v60, 0.0  ;;  %1097 = vmatpush3.bf16.msra.mxu1 %v1094_v8  ;;  %v66_v60 = vld [vmem:[%s1478_s5 + $0x70] sm:$0xff] }
 0x654   :  { %526 = vadd.xlane.f32.xlu0 %v525_v61  ;;  %v67_v61 = vld [vmem:[%s1478_s5 + $0x78] sm:$0xff] }
 0x655   :  { %516 = vadd.xlane.f32.xlu1 %v515_v62  ;;  %v1126_v62 = vpack.c.bf16 %v67_v61, %v66_v60 }
 0x659   :  { %529 = vadd.xlane.f32.xlu1 %v528_v0 }
 0x6de   :  { %v520_v9 = vpop.xlane.xlu1 %519 }
 0x6df   :  { %v522_v12 = vmul.f32 0.03125, %v520_v9 }
 0x6e1   :  { %v527_v10 = vpop.xlane.xlu0 %526  ;;  %v534_v18 = vmul.f32 %v522_v12, %v522_v12  ;;  %v538_v29 = vsub.f32 %v514_v53, %v522_v12  ;;  %v1118_v53 = vpack.c.bf16 %v63_v52, %v62_v50 }
 0x6e2   :  { %v517_v11 = vpop.xlane.xlu1 %516  ;;  %v531_v14 = vmul.f32 0.03125, %v527_v10 }
 0x6e3   :  { %v521_v13 = vmul.f32 0.03125, %v517_v11  ;;  %1119 = vmatprep.subr.bf16.mxu0 %v1118_v53 }
 0x6e4   :  { %1121 = vmatpush3.bf16.msra.mxu0 %v1118_v53 }
 0x6e5   :  { %v533_v15 = vmul.f32 %v521_v13, %v521_v13  ;;  %v537_v27 = vsub.f32 %v513_v58, %v521_v13  ;;  %v65_v58 = vld [vmem:[%s1478_s5 + $0x68] sm:$0xff] }
 0x6e6   :  { %v530_v16 = vpop.xlane.xlu1 %529  ;;  %v1122_v59 = vpack.c.bf16 %v65_v58, %v64_v55  ;;  %v773_v58 = vsub.s32 4, %v1308_v54 }
 0x6e7   :  { %v535_v19 = vsub.f32 %v531_v14, %v533_v15  ;;  %v532_v20 = vmul.f32 0.03125, %v530_v16 }
 0x6e8   :  { %1123 = vmatprep.subr.bf16.mxu0 %v1122_v59  ;;  %v774_v61 = vrot.slane %v1314_v56, %v773_v58 }
 0x6e9   :  { %v539_v21 = vadd.f32 1e-12, %v535_v19  ;;  %v536_v22 = vsub.f32 %v532_v20, %v534_v18  ;;  %1125 = vmatpush3.bf16.msra.mxu0 %v1122_v59  ;;  %v779_v59 = vsub.s32 5, %v1308_v54 }
 0x6ea   :  { %1127 = vmatprep.subr.bf16.mxu0 %v1126_v62 }
 0x6eb   :  { %1166 = vrsqrt.f32 %v539_v21  ;;  %v540_v23 = vadd.f32 1e-12, %v536_v22 }
 0x6ed   :  { %1168 = vrsqrt.f32 %v540_v23  ;;  %1129 = vmatpush3.bf16.msra.mxu0 %v1126_v62  ;;  %v662_v23 = vsub.s32 6, %v1308_v54 }
 0x6ef   :  { %v663_v24 = vrot.slane %v1314_v56, %v662_v23 }
 0x6f5   :  { %v1167_v28 = vpop.eup %1166 }
 0x6f6   :  { %v543_v30 = vmul.f32 %v1167_v28, %v537_v27 }
 0x6f7   :  { %v1169_v1 = vpop.eup %1168 }
 0x6f8   :  { %v549_v32 = vmul.f32 %v548_v26, %v543_v30  ;;  %v544_v17 = vmul.f32 %v1169_v1, %v538_v29 }
 0x6fa   :  { %v550_v33 = vmul.f32 %v548_v26, %v544_v17  ;;  %v1374_v34 = vadd.f32 %v554_v31, %v549_v32 }
 0x6fc   :  { %v1376_v35 = vadd.f32 %v554_v31, %v550_v33  ;;  %1007 = vmatprep.mubr.msk.f32.mxu1 %vm164_vm3, %v1374_v34 }
 0x6fe   :  { %1008 = vmatmul.mubr.msk.f32.vlgmr.msra.gmra.mrb[4].mxu1 %vm164_vm3, %v1376_v35 }
 0x7d1   :  { %v1009_v0 = vpop.f32.mrb[4].mxu1 }
 0x7d2   :  { %v639_v2 = vadd.f32 %v1009_v0, %v560_v63  ;;  %v633_v3 = vpop.f32.mrb[5].mxu1  ;;  %v780_v0 = vrot.slane %v1314_v56, %v779_v59 }
 0x7d3   :  { %v634_v4 = vadd.f32 %v633_v3, %v560_v63 }
 0x7d4   :  { %v643_v5 = vmul.f32 %v639_v2, %v639_v2 }
 0x7d5   :  { %v642_v6 = vmul.f32 %v634_v4, %v634_v4 }
 0x7d6   :  { %v645_v8 = vmul.f32 %v643_v5, %v639_v2 }
 0x7d7   :  { %v644_v9 = vmul.f32 %v642_v6, %v634_v4 }
 0x7d8   :  { %v647_v10 = vmul.f32 0.044715, %v645_v8 }
 0x7d9   :  { %v646_v11 = vmul.f32 0.044715, %v644_v9 }
 0x7da   :  { %v649_v12 = vadd.f32 %v647_v10, %v639_v2  ;;  %v785_v10 = vsub.s32 7, %v1308_v54 }
 0x7db   :  { %v648_v13 = vadd.f32 %v646_v11, %v634_v4 }
 0x7dc   :  { %v651_v14 = vmul.f32 0.7978846, %v649_v12  ;;  %v786_v11 = vrot.slane %v1314_v56, %v785_v10 }
 0x7dd   :  { %v650_v15 = vmul.f32 0.7978846, %v648_v13 }
 0x7de   :  { %1170 = vtanh.f32 %v651_v14 }
 0x7df   :  { %1172 = vtanh.f32 %v650_v15 }
 0x7e8   :  { %v1171_v16 = vpop.eup %1170 }
 0x7e9   :  { %v1173_v18 = vpop.eup %1172  ;;  %v655_v19 = vadd.f32 1.0, %v1171_v16 }
 0x7ea   :  { %v654_v57 = vadd.f32 1.0, %v1173_v18 }
 0x7eb   :  { %v657_v7 = vmul.f32 0.5, %v655_v19 }
 0x7ec   :  { %v656_v20 = vmul.f32 0.5, %v654_v57 }
 0x7ed   :  { %v659_v22 = vmul.f32 %v657_v7, %v639_v2 }
 0x7ee   :  { %v658_v21 = vmul.f32 %v656_v20, %v634_v4 }
 0x7f0   :  { %1042 = vmatprep.mubr.f32.mxu0 %v658_v21 }
 0x7f1   :  { %1043 = vmatmul.mubr.f32.vlgmr.msra.gmra.mrb[4].mxu0 %v659_v22 }
 0x8c4   :  { %v1044_v25 = vpop.f32.mrb[4].mxu0 }
 0x8c5   :  { %v736_v26 = vadd.f32 %v1044_v25, %v663_v24  ;;  %v730_v27 = vpop.f32.mrb[5].mxu0 }
 0x8c6   :  { %v731_v28 = vadd.f32 %v730_v27, %v663_v24 }
 0x8c7   :  { %v740_v29 = vadd.f32 %v736_v26, %v1376_v35  ;;  %v42_v35 = vld [vmem:[%s1477_s4 + $0x10] sm:$0xff] }
 0x8c8   :  { %v739_v30 = vadd.f32 %v731_v28, %v1374_v34  ;;  %v45_v34 = vld [vmem:[%s1477_s4 + $0x28] sm:$0xff]  ;;  %s1210_s4 = smov [#allocation2]  }
 0x8c9   :  { %v744_v31 = vsel %vm164_vm3, %v740_v29, 0.0  ;;  %v750_v33 = vmul.f32 %v740_v29, %v740_v29  ;;  %v1130_v37 = vpack.c.bf16 %v45_v34, %v42_v35  ;;  %s879_s29 = sshll.u32 %s1210_s4, 4  ;;  %s880_s29 = int_to_ptr.vmem [resolvable:$true] %s879_s29 }
 0x8ca   :  { %745 = vadd.xlane.f32.xlu1 %v744_v31  ;;  %v741_v1 = vsel %vm164_vm3, %v739_v30, 0.0  ;;  %v749_v32 = vmul.f32 %v739_v30, %v739_v30  ;;  %s1182_s30 = scalar_lea.vmem %s880_s29, 128  ;;  %p1187_p1 = scmp.lt.s32.totalorder %s880_s29, %s880_s29 }
 0x8cb   :  { %v754_v36 = vsel %vm164_vm3, %v750_v33, 0.0  ;;  %1131 = vmatprep.subr.bf16.mxu1 %v1130_v37  ;;  %p1183_p0 = scmp.ne.s32.totalorder %s880_s29, %s1182_s30  ;;  %p1188_p2 = scmp.lt.s32.totalorder %s1182_s30, %s1182_s30 }
 0x8cc   :  { %v751_v17 = vsel %vm164_vm3, %v749_v32, 0.0  ;;  %1133 = vmatpush3.bf16.msra.mxu1 %v1130_v37 }
 0x8cd   :  { %1135 = vmatprep.subr.bf16.mxu1 %v1134_v40  ;;  %p1189_p3 = por %p1188_p2, %p1187_p1 }
 0x8ce   :  { %742 = vadd.xlane.f32.xlu1 %v741_v1 }
 0x8cf   :  { %p1190_p4 = pnand %p1189_p3, %p1183_p0 }
 0x8d0   :  { %1137 = vmatpush3.bf16.msra.mxu1 %v1134_v40 }
 0x8d2   :  { %752 = vadd.xlane.f32.xlu1 %v751_v17 }
 0x8d6   :  { %755 = vadd.xlane.f32.xlu1 %v754_v36 }
 0x957   :  { %v746_v41 = vpop.xlane.xlu1 %745 }
 0x958   :  { %v748_v45 = vmul.f32 0.03125, %v746_v41 }
 0x95a   :  { %v760_v50 = vmul.f32 %v748_v45, %v748_v45  ;;  %v764_v2 = vsub.f32 %v740_v29, %v748_v45 }
 0x95b   :  { %v743_v42 = vpop.xlane.xlu1 %742 }
 0x95c   :  { %v747_v43 = vmul.f32 0.03125, %v743_v42 }
 0x95e   :  { %v759_v46 = vmul.f32 %v747_v43, %v747_v43  ;;  %v763_v60 = vsub.f32 %v739_v30, %v747_v43 }
 0x95f   :  { %v753_v44 = vpop.xlane.xlu1 %752 }
 0x960   :  { %v757_v47 = vmul.f32 0.03125, %v753_v44 }
 0x962   :  { %v761_v48 = vsub.f32 %v757_v47, %v759_v46 }
 0x963   :  { %v756_v49 = vpop.xlane.xlu1 %755 }
 0x964   :  { %v765_v51 = vadd.f32 1e-12, %v761_v48  ;;  %v758_v52 = vmul.f32 0.03125, %v756_v49 }
 0x966   :  { %1174 = vrsqrt.f32 %v765_v51  ;;  %v762_v53 = vsub.f32 %v758_v52, %v760_v50 }
 0x968   :  { %v766_v55 = vadd.f32 1e-12, %v762_v53 }
 0x96a   :  { %1176 = vrsqrt.f32 %v766_v55 }
 0x970   :  { %v1175_v62 = vpop.eup %1174 }
 0x971   :  { %v769_v63 = vmul.f32 %v1175_v62, %v763_v60 }
 0x973   :  { %v775_v3 = vmul.f32 %v774_v61, %v769_v63 }
 0x974   :  { %v1177_v4 = vpop.eup %1176 }
 0x975   :  { %v770_v5 = vmul.f32 %v1177_v4, %v764_v2  ;;  %v781_v6 = vadd.f32 %v780_v0, %v775_v3 }
 0x977   :  { %v776_v8 = vmul.f32 %v774_v61, %v770_v5  ;;  %1053 = vmatprep.mubr.msk.f32.mxu1 %vm164_vm3, %v781_v6 }
 0x979   :  { %v782_v9 = vadd.f32 %v780_v0, %v776_v8 }
 0x97b   :  { %1054 = vmatmul.mubr.msk.f32.vlgmr.msra.gmra.mrb[6].mxu1 %vm164_vm3, %v782_v9 }
 0xa4e   :  { %v1055_v12 = vpop.f32.mrb[6].mxu1 }
 0xa4f   :  { %v865_v13 = vadd.f32 %v1055_v12, %v786_v11  ;;  %v859_v14 = vpop.f32.mrb[7].mxu1 }
 0xa50   :  { %v860_v15 = vadd.f32 %v859_v14, %v786_v11 }
 0xa51   :  { %1178 = vtanh.f32 %v865_v13 }
 0xa52   :  { %1180 = vtanh.f32 %v860_v15 }
 0xa5b   :  { %v1179_v16 = vpop.eup %1178 }
 0xa5c   :  { %v1181_v18 = vpop.eup %1180  ;;  %872 = vst [vmem:[#allocation2 + $0x1] sm:$0x1] %v1179_v16 }
 0xa5d   :  { %871 = vst [vmem:[#allocation2] sm:$0x1] %v1181_v18 }
 0xa5e   :  { %1193 = shalt.err (!%p1190_p4)
}
 0xa5f   :  { %s1194_s10 = scalar_lea.hbm %s1480_s7, 128 }
 0xa60   :  { %p1195_p5 = scmp.ne.s32.totalorder %s1480_s7, %s1194_s10  ;;  %p1198_p6 = scmp.lt.u32.totalorder %s1194_s10, %s1480_s7 }
 0xa62   :  { %p1200_p7 = pnand %p1198_p6, %p1195_p5 }
 0xa64   :  { %1203 = shalt.err (!%p1200_p7)
}
 0xa65   :  { %882 = dma.vmem_to_hbm [thread:$0]  %s880_s29, 128, %s1480_s7, [#allocation3]  }
 0xa66   :  { %1204 = dma.done.wait [#allocation3], 128  }
 0xa67   :  { %1205 = vsyncadd [#allocation3], 4294967168 }
 0xa68   :  { %886 = vsyncpa [#allocation3], 1 }

</bundles_post_ra>
